<compile_context>
chip_gen: v7x
topology: tpu7x:2x2x1
jax: 0.10.0
libtpu: 0.0.40
codegen_flags: <defaults>
</compile_context>

<pallas_src>
import jax
import jax.numpy as jnp
import numpy as np
from jax.experimental import pallas as pl
from jax.experimental.pallas import tpu as pltpu


def decoder_rnn_kernel(
    toks_ref,        # SMEM scalar-prefetch: (T,) int32 (consumed by index_maps)
    emb_ref,         # (1, 1, Hp)  bf16 : embedding row for this step's token
    h0_ref,          # (1, Hp)     f32  : initial hidden (context vector)
    wi_ref,          # (Hp, 3Hp)   bf16 : fused input->gates weights  [r|z|n]
    wh_ref,          # (Hp, 3Hp)   bf16 : fused hidden->gates weights [r|z|n]
    bi_ref,          # (1, 3Hp)    f32  : [b_ir+b_hr | b_iz+b_hz | b_in]
    bhn_ref,         # (1, Hp)     f32  : b_hn (multiplied by r inside the cell)
    wo_ref,          # (Hp, Vp)    bf16 : output projection (transposed)
    bo_ref,          # (1, Vp)     f32  : output bias (-1e30 on padded lanes)
    logp_ref,        # out (1, 1, Vp) f32 : this step's log-probs
    hout_ref,        # out (1, Hp)    f32 : final hidden state
    h_scratch,       # VMEM (1, Hp)   f32 : hidden carried across grid steps
):
    t = pl.program_id(0)
    Hp = h0_ref.shape[1]

    @pl.when(t == 0)
    def _():
        h_scratch[...] = h0_ref[...]

    h = h_scratch[...]                                      # f32 (1, Hp)
    x = jnp.maximum(emb_ref[...].reshape(1, Hp), 0)         # relu(embedding), bf16

    # --- GRU cell, PyTorch gate order (r, z, n), 2 fused matmuls ----------
    gi = jnp.dot(x, wi_ref[...], preferred_element_type=jnp.float32) + bi_ref[...]
    gh = jnp.dot(h.astype(jnp.bfloat16), wh_ref[...],
                 preferred_element_type=jnp.float32)

    r = jax.nn.sigmoid(gi[:, 0 * Hp:1 * Hp] + gh[:, 0 * Hp:1 * Hp])
    z = jax.nn.sigmoid(gi[:, 1 * Hp:2 * Hp] + gh[:, 1 * Hp:2 * Hp])
    n = jnp.tanh(gi[:, 2 * Hp:3 * Hp] + r * (gh[:, 2 * Hp:3 * Hp] + bhn_ref[...]))
    h_new = (1.0 - z) * n + z * h                           # f32 (1, Hp)

    h_scratch[...] = h_new
    hout_ref[...] = h_new

    # --- Linear(H -> V) + LogSoftmax (padded lanes carry -1e30 logits) ----
    logits = jnp.dot(h_new.astype(jnp.bfloat16), wo_ref[...],
                     preferred_element_type=jnp.float32) + bo_ref[...]
    m = jnp.max(logits, axis=-1, keepdims=True)
    lse = jnp.log(jnp.sum(jnp.exp(logits - m), axis=-1, keepdims=True)) + m
    logp_ref[...] = (logits - lse).reshape(1, 1, logits.shape[-1])


def _round_up(x, m):
    return ((x + m - 1) // m) * m


def decoder_rnn_forward(tokens, hidden, params):
    """tokens: int32 scalar (single step, exactly the PyTorch forward) or (T,)
    array of teacher-forced tokens decoded inside a single pallas_call.
    hidden: (1, 1, H) f32 context vector.
    Returns (log_probs (T, V), hidden (1, 1, H), None)."""
    H = params["hidden_size"]
    V = params["output_size"]
    Hp = _round_up(max(H, 128), 128)
    Vp = _round_up(max(V, 128), 128)

    toks = jnp.asarray(tokens, dtype=jnp.int32).reshape(-1)
    T = int(toks.shape[0])

    wdt = jnp.bfloat16   # weight dtype feeding the MXU (accumulation stays f32)

    def pad2(a, r, c):
        return jnp.pad(a, ((0, r - a.shape[0]), (0, c - a.shape[1])))

    def pad1(v, n):
        return jnp.pad(v, (0, n - v.shape[0]))

    w_ih, w_hh = params["w_ih"], params["w_hh"]          # (3H, H), gate order r,z,n
    b_ih, b_hh = params["b_ih"], params["b_hh"]          # (3H,)

    # Fused (in, out)-layout gate weights, zero-padded to (Hp, 3Hp).
    wi = jnp.concatenate(
        [pad2(w_ih[g * H:(g + 1) * H].T, Hp, Hp) for g in range(3)], axis=1).astype(wdt)
    wh = jnp.concatenate(
        [pad2(w_hh[g * H:(g + 1) * H].T, Hp, Hp) for g in range(3)], axis=1).astype(wdt)

    # Pre-summed biases: r/z take (b_i + b_h); n keeps b_in on the x-path and
    # b_hn separate because it is scaled by r.
    bi = jnp.concatenate([
        pad1(b_ih[0 * H:1 * H] + b_hh[0 * H:1 * H], Hp),
        pad1(b_ih[1 * H:2 * H] + b_hh[1 * H:2 * H], Hp),
        pad1(b_ih[2 * H:3 * H], Hp),
    ]).reshape(1, 3 * Hp).astype(jnp.float32)
    bhn = pad1(b_hh[2 * H:3 * H], Hp).reshape(1, Hp).astype(jnp.float32)

    # Output projection (Hp, Vp); padded vocab lanes get a -1e30 bias so they
    # never affect the log-softmax max or sum.
    wo = pad2(params["w_out"].T, Hp, Vp).astype(wdt)
    bo = jnp.concatenate([
        params["b_out"].astype(jnp.float32),
        jnp.full((Vp - V,), -1e30, dtype=jnp.float32),
    ]).reshape(1, Vp)

    # Embedding as (V, 1, Hp) bf16: one row per block, gathered per step via the
    # scalar-prefetched token in the index_map (no full-table DMA).
    emb = jnp.pad(params["embedding"], ((0, 0), (0, Hp - H))).astype(wdt).reshape(V, 1, Hp)

    h0 = jnp.pad(hidden.reshape(1, H).astype(jnp.float32), ((0, 0), (0, Hp - H)))

    grid_spec = pltpu.PrefetchScalarGridSpec(
        num_scalar_prefetch=1,
        grid=(T,),
        in_specs=[
            pl.BlockSpec((1, 1, Hp), lambda t, toks: (toks[t], 0, 0)),   # embedding row
            pl.BlockSpec((1, Hp), lambda t, toks: (0, 0)),               # h0
            pl.BlockSpec((Hp, 3 * Hp), lambda t, toks: (0, 0)),          # wi (grid-resident)
            pl.BlockSpec((Hp, 3 * Hp), lambda t, toks: (0, 0)),          # wh (grid-resident)
            pl.BlockSpec((1, 3 * Hp), lambda t, toks: (0, 0)),           # bi
            pl.BlockSpec((1, Hp), lambda t, toks: (0, 0)),               # bhn
            pl.BlockSpec((Hp, Vp), lambda t, toks: (0, 0)),              # w_out (grid-resident)
            pl.BlockSpec((1, Vp), lambda t, toks: (0, 0)),               # b_out
        ],
        out_specs=(
            pl.BlockSpec((1, 1, Vp), lambda t, toks: (t, 0, 0)),         # per-step log-probs
            pl.BlockSpec((1, Hp), lambda t, toks: (0, 0)),               # final hidden
        ),
        scratch_shapes=[pltpu.VMEM((1, Hp), jnp.float32)],               # carried hidden
    )

    logp_pad, h_pad = pl.pallas_call(
        decoder_rnn_kernel,
        out_shape=(
            jax.ShapeDtypeStruct((T, 1, Vp), jnp.float32),
            jax.ShapeDtypeStruct((1, Hp), jnp.float32),
        ),
        grid_spec=grid_spec,
        compiler_params=pltpu.CompilerParams(
            dimension_semantics=("arbitrary",)),   # sequential: hidden carried across steps
    )(toks, emb, h0, wi, wh, bi, bhn, wo, bo)

    log_probs = logp_pad.reshape(T, Vp)[:, :V]
    new_hidden = h_pad[:, :H].reshape(1, 1, H)
    return log_probs, new_hidden, None


def _reference_forward(tokens, hidden, params):
    """Pure-JAX reference mirroring the kernel's numerics (bf16 weights, f32
    accumulation/state) -- i.e. the PyTorch forward up to the bf16 weight cast."""
    H = params["hidden_size"]
    toks = jnp.asarray(tokens, dtype=jnp.int32).reshape(-1)
    emb = params["embedding"].astype(jnp.bfloat16)
    w_ih = params["w_ih"].astype(jnp.bfloat16)
    w_hh = params["w_hh"].astype(jnp.bfloat16)
    w_out = params["w_out"].astype(jnp.bfloat16)
    b_ih, b_hh, b_out = params["b_ih"], params["b_hh"], params["b_out"]
    h = hidden.reshape(1, H).astype(jnp.float32)
    outs = []
    for i in range(toks.shape[0]):
        x = jnp.maximum(emb[toks[i]].reshape(1, H), 0)
        gi = jnp.dot(x, w_ih.T, preferred_element_type=jnp.float32) + b_ih
        gh = jnp.dot(h.astype(jnp.bfloat16), w_hh.T,
                     preferred_element_type=jnp.float32) + b_hh
        r = jax.nn.sigmoid(gi[:, :H] + gh[:, :H])
        z = jax.nn.sigmoid(gi[:, H:2 * H] + gh[:, H:2 * H])
        n = jnp.tanh(gi[:, 2 * H:] + r * gh[:, 2 * H:])
        h = (1.0 - z) * n + z * h
        logits = jnp.dot(h.astype(jnp.bfloat16), w_out.T,
                         preferred_element_type=jnp.float32) + b_out
        outs.append(jax.nn.log_softmax(logits, axis=-1))
    return jnp.concatenate(outs, axis=0), h.reshape(1, 1, H)


def make_params(hidden_size, output_size, key):
    ks = jax.random.split(key, 7)
    s = 1.0 / np.sqrt(hidden_size)
    return {
        "hidden_size": hidden_size,
        "output_size": output_size,
        "embedding": jax.random.normal(ks[0], (output_size, hidden_size), jnp.float32),
        "w_ih": jax.random.uniform(ks[1], (3 * hidden_size, hidden_size), jnp.float32, -s, s),
        "w_hh": jax.random.uniform(ks[2], (3 * hidden_size, hidden_size), jnp.float32, -s, s),
        "b_ih": jax.random.uniform(ks[3], (3 * hidden_size,), jnp.float32, -s, s),
        "b_hh": jax.random.uniform(ks[4], (3 * hidden_size,), jnp.float32, -s, s),
        "w_out": jax.random.uniform(ks[5], (output_size, hidden_size), jnp.float32, -s, s),
        "b_out": jax.random.uniform(ks[6], (output_size,), jnp.float32, -s, s),
    }


if __name__ == "__main__":
    HIDDEN = 32     # hidden_size / embedding dim
    VOCAB = 64      # output_size (word vocab size)

    key = jax.random.PRNGKey(0)
    k_param, k_hidden = jax.random.split(key)
    params = make_params(HIDDEN, VOCAB, k_param)
    hidden = jax.random.normal(k_hidden, (1, 1, HIDDEN), jnp.float32)  # context vector

    # --- single step: exactly the PyTorch module's forward ------------------
    token = jnp.array(3, dtype=jnp.int32)                               # SOS token id
    log_probs, new_hidden, attn = decoder_rnn_forward(token, hidden, params)
    jax.block_until_ready(log_probs)
    jax.block_until_ready(new_hidden)

    ref_lp, ref_h = _reference_forward(token, hidden, params)
    np.testing.assert_allclose(np.asarray(log_probs), np.asarray(ref_lp), atol=1e-2, rtol=1e-2)
    np.testing.assert_allclose(np.asarray(new_hidden), np.asarray(ref_h), atol=1e-2, rtol=1e-2)
    assert log_probs.shape == (1, VOCAB) and new_hidden.shape == (1, 1, HIDDEN) and attn is None

    # --- 8 teacher-forced decode steps inside ONE pallas_call ----------------
    tokens = jnp.array([3, 7, 1, 42, 9, 0, 17, 5], dtype=jnp.int32)
    seq_lp, seq_h, _ = decoder_rnn_forward(tokens, hidden, params)
    jax.block_until_ready(seq_lp)
    jax.block_until_ready(seq_h)

    ref_seq_lp, ref_seq_h = _reference_forward(tokens, hidden, params)
    np.testing.assert_allclose(np.asarray(seq_lp), np.asarray(ref_seq_lp), atol=1e-2, rtol=1e-2)
    np.testing.assert_allclose(np.asarray(seq_h), np.asarray(ref_seq_h), atol=1e-2, rtol=1e-2)
    assert seq_lp.shape == (len(tokens), VOCAB) and seq_h.shape == (1, 1, HIDDEN)

    print("KERNEL_OK")
</pallas_src>

<mosaic_0001>
module attributes {stable_mosaic.version = 11 : i64} {
  func.func @decoder_rnn_kernel(%arg0: i32, %arg1: memref<1xi32, #tpu.memory_space<smem>>, %arg2: memref<1x1x128xbf16, #tpu.memory_space<vmem>>, %arg3: memref<1x128xf32, #tpu.memory_space<vmem>>, %arg4: memref<128x384xbf16, #tpu.memory_space<vmem>>, %arg5: memref<128x384xbf16, #tpu.memory_space<vmem>>, %arg6: memref<1x384xf32, #tpu.memory_space<vmem>>, %arg7: memref<1x128xf32, #tpu.memory_space<vmem>>, %arg8: memref<128x128xbf16, #tpu.memory_space<vmem>>, %arg9: memref<1x128xf32, #tpu.memory_space<vmem>>, %arg10: memref<1x1x128xf32, #tpu.memory_space<vmem>>, %arg11: memref<1x128xf32, #tpu.memory_space<vmem>>, %arg12: memref<1x128xf32, #tpu.memory_space<vmem>>) attributes {dimension_semantics = [#tpu.dimension_semantics<arbitrary>], iteration_bounds = array<i64: 1>, scalar_prefetch = 1 : i64, scratch_operands = 1 : i64, tpu.core_type = #tpu.core_type<tc>, window_params = [{transform_indices = @transform_0, window_bounds = array<i64: 1, 1, 128>}, {pipeline_mode = #tpu.pipeline_mode<synchronous>, transform_indices = @transform_1, window_bounds = array<i64: 1, 128>}, {pipeline_mode = #tpu.pipeline_mode<synchronous>, transform_indices = @transform_2, window_bounds = array<i64: 128, 384>}, {pipeline_mode = #tpu.pipeline_mode<synchronous>, transform_indices = @transform_3, window_bounds = array<i64: 128, 384>}, {pipeline_mode = #tpu.pipeline_mode<synchronous>, transform_indices = @transform_4, window_bounds = array<i64: 1, 384>}, {pipeline_mode = #tpu.pipeline_mode<synchronous>, transform_indices = @transform_5, window_bounds = array<i64: 1, 128>}, {pipeline_mode = #tpu.pipeline_mode<synchronous>, transform_indices = @transform_6, window_bounds = array<i64: 128, 128>}, {pipeline_mode = #tpu.pipeline_mode<synchronous>, transform_indices = @transform_7, window_bounds = array<i64: 1, 128>}, {transform_indices = @transform_8, window_bounds = array<i64: 1, 1, 128>}, {pipeline_mode = #tpu.pipeline_mode<synchronous>, transform_indices = @transform_9, window_bounds = array<i64: 1, 128>}]} {
    %c0_i32 = arith.constant 0 : i32
    %0 = arith.cmpi eq, %arg0, %c0_i32 : i32
    %1 = arith.extui %0 : i1 to i32
    %c0_i32_0 = arith.constant 0 : i32
    %2 = arith.cmpi ne, %1, %c0_i32_0 : i32
    scf.if %2 {
      %c0_32 = arith.constant 0 : index
      %c0_33 = arith.constant 0 : index
      %63 = vector.load %arg3[%c0_32, %c0_33] : memref<1x128xf32, #tpu.memory_space<vmem>>, vector<1x128xf32>
      %c0_34 = arith.constant 0 : index
      %c0_35 = arith.constant 0 : index
      %64 = vector.load %arg12[%c0_34, %c0_35] : memref<1x128xf32, #tpu.memory_space<vmem>>, vector<1x128xf32>
      tpu.vector_store %arg12[%c0_34, %c0_35], %63 {strides = array<i32>} : memref<1x128xf32, #tpu.memory_space<vmem>>, vector<1x128xf32>,
    } else {
    }
    %c0 = arith.constant 0 : index
    %c0_1 = arith.constant 0 : index
    %3 = vector.load %arg12[%c0, %c0_1] : memref<1x128xf32, #tpu.memory_space<vmem>>, vector<1x128xf32>
    %c0_2 = arith.constant 0 : index
    %c0_3 = arith.constant 0 : index
    %c0_4 = arith.constant 0 : index
    %4 = vector.load %arg2[%c0_2, %c0_3, %c0_4] : memref<1x1x128xbf16, #tpu.memory_space<vmem>>, vector<1x1x128xbf16>
    %5 = vector.shape_cast %4 : vector<1x1x128xbf16> to vector<1x128xbf16>
    %cst = arith.constant 0.000000e+00 : bf16
    %6 = vector.broadcast %cst : bf16 to vector<1x128xbf16>
    %7 = arith.maximumf %5, %6 : vector<1x128xbf16>
    %c0_5 = arith.constant 0 : index
    %c0_6 = arith.constant 0 : index
    %8 = vector.load %arg4[%c0_5, %c0_6] : memref<128x384xbf16, #tpu.memory_space<vmem>>, vector<128x384xbf16>
    %cst_7 = arith.constant dense<0.000000e+00> : vector<1x384xf32>
    %9 = tpu.matmul %7, %8, %cst_7 {dimension_numbers = #tpu.dot_dimension_numbers<[1], [0], [0], [1], [0, 0, 1, 1], [], []>} : vector<1x128xbf16>, vector<128x384xbf16>, vector<1x384xf32> -> vector<1x384xf32>
    %c0_8 = arith.constant 0 : index
    %c0_9 = arith.constant 0 : index
    %10 = vector.load %arg6[%c0_8, %c0_9] : memref<1x384xf32, #tpu.memory_space<vmem>>, vector<1x384xf32>
    %11 = arith.addf %9, %10 : vector<1x384xf32>
    %12 = arith.truncf %3 : vector<1x128xf32> to vector<1x128xbf16>
    %c0_10 = arith.constant 0 : index
    %c0_11 = arith.constant 0 : index
    %13 = vector.load %arg5[%c0_10, %c0_11] : memref<128x384xbf16, #tpu.memory_space<vmem>>, vector<128x384xbf16>
    %cst_12 = arith.constant dense<0.000000e+00> : vector<1x384xf32>
    %14 = tpu.matmul %12, %13, %cst_12 {dimension_numbers = #tpu.dot_dimension_numbers<[1], [0], [0], [1], [0, 0, 1, 1], [], []>} : vector<1x128xbf16>, vector<128x384xbf16>, vector<1x384xf32> -> vector<1x384xf32>
    %15 = vector.extract_strided_slice %11 {offsets = [0, 0], sizes = [1, 128], strides = [1, 1]} : vector<1x384xf32> to vector<1x128xf32>
    %16 = vector.extract_strided_slice %14 {offsets = [0, 0], sizes = [1, 128], strides = [1, 1]} : vector<1x384xf32> to vector<1x128xf32>
    %17 = arith.addf %15, %16 : vector<1x128xf32>
    %18 = arith.negf %17 : vector<1x128xf32>
    %19 = math.exp %18 : vector<1x128xf32>
    %cst_13 = arith.constant 1.000000e+00 : f32
    %20 = vector.broadcast %cst_13 : f32 to vector<1x128xf32>
    %21 = arith.addf %20, %19 : vector<1x128xf32>
    %22 = arith.divf %20, %21 : vector<1x128xf32>
    %23 = vector.extract_strided_slice %11 {offsets = [0, 128], sizes = [1, 128], strides = [1, 1]} : vector<1x384xf32> to vector<1x128xf32>
    %24 = vector.extract_strided_slice %14 {offsets = [0, 128], sizes = [1, 128], strides = [1, 1]} : vector<1x384xf32> to vector<1x128xf32>
    %25 = arith.addf %23, %24 : vector<1x128xf32>
    %26 = arith.negf %25 : vector<1x128xf32>
    %27 = math.exp %26 : vector<1x128xf32>
    %cst_14 = arith.constant 1.000000e+00 : f32
    %28 = vector.broadcast %cst_14 : f32 to vector<1x128xf32>
    %29 = arith.addf %28, %27 : vector<1x128xf32>
    %30 = arith.divf %28, %29 : vector<1x128xf32>
    %31 = vector.extract_strided_slice %11 {offsets = [0, 256], sizes = [1, 128], strides = [1, 1]} : vector<1x384xf32> to vector<1x128xf32>
    %32 = vector.extract_strided_slice %14 {offsets = [0, 256], sizes = [1, 128], strides = [1, 1]} : vector<1x384xf32> to vector<1x128xf32>
    %c0_15 = arith.constant 0 : index
    %c0_16 = arith.constant 0 : index
    %33 = vector.load %arg7[%c0_15, %c0_16] : memref<1x128xf32, #tpu.memory_space<vmem>>, vector<1x128xf32>
    %34 = arith.addf %32, %33 : vector<1x128xf32>
    %35 = arith.mulf %22, %34 : vector<1x128xf32>
    %36 = arith.addf %31, %35 : vector<1x128xf32>
    %37 = math.tanh %36 : vector<1x128xf32>
    %cst_17 = arith.constant 1.000000e+00 : f32
    %38 = vector.broadcast %cst_17 : f32 to vector<1x128xf32>
    %39 = arith.subf %38, %30 : vector<1x128xf32>
    %40 = arith.mulf %39, %37 : vector<1x128xf32>
    %41 = arith.mulf %30, %3 : vector<1x128xf32>
    %42 = arith.addf %40, %41 : vector<1x128xf32>
    %c0_18 = arith.constant 0 : index
    %c0_19 = arith.constant 0 : index
    %43 = vector.load %arg12[%c0_18, %c0_19] : memref<1x128xf32, #tpu.memory_space<vmem>>, vector<1x128xf32>
    tpu.vector_store %arg12[%c0_18, %c0_19], %42 {strides = array<i32>} : memref<1x128xf32, #tpu.memory_space<vmem>>, vector<1x128xf32>,
    %c0_20 = arith.constant 0 : index
    %c0_21 = arith.constant 0 : index
    %44 = vector.load %arg11[%c0_20, %c0_21] : memref<1x128xf32, #tpu.memory_space<vmem>>, vector<1x128xf32>
    tpu.vector_store %arg11[%c0_20, %c0_21], %42 {strides = array<i32>} : memref<1x128xf32, #tpu.memory_space<vmem>>, vector<1x128xf32>,
    %45 = arith.truncf %42 : vector<1x128xf32> to vector<1x128xbf16>
    %c0_22 = arith.constant 0 : index
    %c0_23 = arith.constant 0 : index
    %46 = vector.load %arg8[%c0_22, %c0_23] : memref<128x128xbf16, #tpu.memory_space<vmem>>, vector<128x128xbf16>
    %cst_24 = arith.constant dense<0.000000e+00> : vector<1x128xf32>
    %47 = tpu.matmul %45, %46, %cst_24 {dimension_numbers = #tpu.dot_dimension_numbers<[1], [0], [0], [1], [0, 0, 1, 1], [], []>} : vector<1x128xbf16>, vector<128x128xbf16>, vector<1x128xf32> -> vector<1x128xf32>
    %c0_25 = arith.constant 0 : index
    %c0_26 = arith.constant 0 : index
    %48 = vector.load %arg9[%c0_25, %c0_26] : memref<1x128xf32, #tpu.memory_space<vmem>>, vector<1x128xf32>
    %49 = arith.addf %47, %48 : vector<1x128xf32>
    %cst_27 = arith.constant dense<0xFF800000> : vector<1xf32>
    %50 = vector.multi_reduction <maximumf>, %49, %cst_27 [1] : vector<1x128xf32> to vector<1xf32>
    %51 = vector.shape_cast %50 : vector<1xf32> to vector<1x1xf32>
    %52 = vector.broadcast %51 : vector<1x1xf32> to vector<1x128xf32>
    %53 = arith.subf %49, %52 : vector<1x128xf32>
    %54 = math.exp %53 : vector<1x128xf32>
    %cst_28 = arith.constant dense<0.000000e+00> : vector<1xf32>
    %55 = vector.multi_reduction <add>, %54, %cst_28 [1] : vector<1x128xf32> to vector<1xf32>
    %56 = vector.shape_cast %55 : vector<1xf32> to vector<1x1xf32>
    %57 = math.log %56 : vector<1x1xf32>
    %58 = arith.addf %57, %51 : vector<1x1xf32>
    %59 = vector.broadcast %58 : vector<1x1xf32> to vector<1x128xf32>
    %60 = arith.subf %49, %59 : vector<1x128xf32>
    %61 = vector.shape_cast %60 : vector<1x128xf32> to vector<1x1x128xf32>
    %c0_29 = arith.constant 0 : index
    %c0_30 = arith.constant 0 : index
    %c0_31 = arith.constant 0 : index
    %62 = vector.load %arg10[%c0_29, %c0_30, %c0_31] : memref<1x1x128xf32, #tpu.memory_space<vmem>>, vector<1x1x128xf32>
    tpu.vector_store %arg10[%c0_29, %c0_30, %c0_31], %61 {strides = array<i32>} : memref<1x1x128xf32, #tpu.memory_space<vmem>>, vector<1x1x128xf32>,
    return
  }
  func.func @transform_0(%arg0: i32, %arg1: memref<1xi32, #tpu.memory_space<smem>>) -> (i32, i32, i32) {
    %0 = arith.index_cast %arg0 : i32 to index
    %1 = memref.load %arg1[%0] : memref<1xi32, #tpu.memory_space<smem>>
    %c0_i32 = arith.constant 0 : i32
    %c0_i32_0 = arith.constant 0 : i32
    %c0_i32_1 = arith.constant 0 : i32
    return %1, %c0_i32, %c0_i32_0 : i32, i32, i32
  }
  func.func @transform_1(%arg0: i32, %arg1: memref<1xi32, #tpu.memory_space<smem>>) -> (i32, i32) {
    %c0_i32 = arith.constant 0 : i32
    %c0_i32_0 = arith.constant 0 : i32
    %c0_i32_1 = arith.constant 0 : i32
    return %c0_i32, %c0_i32_0 : i32, i32
  }
  func.func @transform_2(%arg0: i32, %arg1: memref<1xi32, #tpu.memory_space<smem>>) -> (i32, i32) {
    %c0_i32 = arith.constant 0 : i32
    %c0_i32_0 = arith.constant 0 : i32
    %c0_i32_1 = arith.constant 0 : i32
    return %c0_i32, %c0_i32_0 : i32, i32
  }
  func.func @transform_3(%arg0: i32, %arg1: memref<1xi32, #tpu.memory_space<smem>>) -> (i32, i32) {
    %c0_i32 = arith.constant 0 : i32
    %c0_i32_0 = arith.constant 0 : i32
    %c0_i32_1 = arith.constant 0 : i32
    return %c0_i32, %c0_i32_0 : i32, i32
  }
  func.func @transform_4(%arg0: i32, %arg1: memref<1xi32, #tpu.memory_space<smem>>) -> (i32, i32) {
    %c0_i32 = arith.constant 0 : i32
    %c0_i32_0 = arith.constant 0 : i32
    %c0_i32_1 = arith.constant 0 : i32
    return %c0_i32, %c0_i32_0 : i32, i32
  }
  func.func @transform_5(%arg0: i32, %arg1: memref<1xi32, #tpu.memory_space<smem>>) -> (i32, i32) {
    %c0_i32 = arith.constant 0 : i32
    %c0_i32_0 = arith.constant 0 : i32
    %c0_i32_1 = arith.constant 0 : i32
    return %c0_i32, %c0_i32_0 : i32, i32
  }
  func.func @transform_6(%arg0: i32, %arg1: memref<1xi32, #tpu.memory_space<smem>>) -> (i32, i32) {
    %c0_i32 = arith.constant 0 : i32
    %c0_i32_0 = arith.constant 0 : i32
    %c0_i32_1 = arith.constant 0 : i32
    return %c0_i32, %c0_i32_0 : i32, i32
  }
  func.func @transform_7(%arg0: i32, %arg1: memref<1xi32, #tpu.memory_space<smem>>) -> (i32, i32) {
    %c0_i32 = arith.constant 0 : i32
    %c0_i32_0 = arith.constant 0 : i32
    %c0_i32_1 = arith.constant 0 : i32
    return %c0_i32, %c0_i32_0 : i32, i32
  }
  func.func @transform_8(%arg0: i32, %arg1: memref<1xi32, #tpu.memory_space<smem>>) -> (i32, i32, i32) {
    %c0_i32 = arith.constant 0 : i32
    %c0_i32_0 = arith.constant 0 : i32
    %c0_i32_1 = arith.constant 0 : i32
    return %arg0, %c0_i32, %c0_i32_0 : i32, i32, i32
  }
  func.func @transform_9(%arg0: i32, %arg1: memref<1xi32, #tpu.memory_space<smem>>) -> (i32, i32) {
    %c0_i32 = arith.constant 0 : i32
    %c0_i32_0 = arith.constant 0 : i32
    %c0_i32_1 = arith.constant 0 : i32
    return %c0_i32, %c0_i32_0 : i32, i32
  }
}

</mosaic_0001>

<bundles_post_ra>
// kernel: tpu_custom_call.1
= control target key start
LH: loop header
LB: loop body
LE: loop exit
PB: predicated region body
PF: predicated region fallthrough
CT: control target
= control target key end

     0   :  { %17 = vsyncpa [#allocation6], 0  ;;  %s1303_s0 = inlined_call_operand.<no memory space> [shape: s32[1], index: 0, kind: input, shape index: {}]   ;;  %s1304_s1 = inlined_call_operand.vmem [shape: bf16[64,1,128], index: 1, kind: input, shape index: {}]   ;;  %s1305_s2 = inlined_call_operand.vmem [shape: f32[1,128], index: 2, kind: input, shape index: {}]   ;;  %s1306_s3 = inlined_call_operand.hbm [shape: bf16[128,384], index: 3, kind: input, shape index: {}]   ;;  %s1307_s4 = inlined_call_operand.hbm [shape: bf16[128,384], index: 4, kind: input, shape index: {}]   ;;  %s1308_s5 = inlined_call_operand.vmem [shape: f32[1,384], index: 5, kind: input, shape index: {}]   ;;  %s1309_s6 = inlined_call_operand.vmem [shape: f32[1,128], index: 6, kind: input, shape index: {}]   ;;  %s1310_s7 = inlined_call_operand.vmem [shape: bf16[128,128], index: 7, kind: input, shape index: {}]   ;;  %s1311_s8 = inlined_call_operand.vmem [shape: f32[1,128], index: 8, kind: input, shape index: {}]   ;;  %s1312_s9 = inlined_call_operand.hbm [shape: f32[1,1,128], index: 9, kind: output, shape index: {0}]   ;;  %s1313_s10 = inlined_call_operand.hbm [shape: f32[1,128], index: 10, kind: output, shape index: {1}]  }
   0x1   :  { %18 = vsyncpa [#allocation9], 0 }
   0x2   :  { %19 = vsyncpa [#allocation7], 0 }
   0x3   :  { %20 = vsyncpa [#allocation12], 0  ;;  %s1108_s13 = smov [#allocation5]   ;;  %s1012_s17 = scalar_lea.hbm %s1306_s3, 3072 }
   0x4   :  { %s35_s14 = sshll.u32 %s1108_s13, 4  ;;  %p1013_p0 = scmp.ne.s32.totalorder %s1306_s3, %s1012_s17  ;;  %s36_s14 = int_to_ptr.vmem [resolvable:$true] %s35_s14 }
   0x5   :  { %p1016_p1 = scmp.lt.u32.totalorder %s1012_s17, %s1306_s3 }
   0x7   :  { %p1018_p2 = pnand %p1016_p1, %p1013_p0 }
   0x9   :  { %1021 = shalt.err (!%p1018_p2)
}
   0xa   :  { %s1022_s22 = scalar_lea.vmem %s36_s14, 3072  ;;  %p1027_p4 = scmp.lt.s32.totalorder %s36_s14, %s36_s14 }
   0xb   :  { %p1023_p3 = scmp.ne.s32.totalorder %s36_s14, %s1022_s22  ;;  %p1028_p5 = scmp.lt.s32.totalorder %s1022_s22, %s1022_s22 }
   0xd   :  { %p1029_p6 = por %p1028_p5, %p1027_p4 }
   0xf   :  { %p1030_p7 = pnand %p1029_p6, %p1023_p3 }
  0x11   :  { %1033 = shalt.err (!%p1030_p7)
}
  0x12   :  { %s1109_s23 = smov 192   ;;  %s1110_s24 = smov 12  }
  0x13   :  { %41 = dma.hbm_to_vmem [thread:$0]  %s1306_s3, 3072, %s36_s14, [#allocation6], %s1109_s23, %s1109_s23, %s1110_s24  }
  0x14   :  { %s1111_s27 = smov [#allocation8]   ;;  %s1034_s11 = scalar_lea.hbm %s1307_s4, 3072 }
  0x15   :  { %s47_s28 = sshll.u32 %s1111_s27, 4  ;;  %p1035_p8 = scmp.ne.s32.totalorder %s1307_s4, %s1034_s11  ;;  %s48_s28 = int_to_ptr.vmem [resolvable:$true] %s47_s28 }
  0x16   :  { %p1038_p9 = scmp.lt.u32.totalorder %s1034_s11, %s1307_s4 }
  0x18   :  { %p1040_p10 = pnand %p1038_p9, %p1035_p8 }
  0x1a   :  { %1043 = shalt.err (!%p1040_p10)
}
  0x1b   :  { %s1044_s17 = scalar_lea.vmem %s48_s28, 3072  ;;  %p1049_p12 = scmp.lt.s32.totalorder %s48_s28, %s48_s28 }
  0x1c   :  { %p1045_p11 = scmp.ne.s32.totalorder %s48_s28, %s1044_s17  ;;  %p1050_p13 = scmp.lt.s32.totalorder %s1044_s17, %s1044_s17 }
  0x1e   :  { %p1051_p0 = por %p1050_p13, %p1049_p12 }
  0x20   :  { %p1052_p1 = pnand %p1051_p0, %p1045_p11 }
  0x22   :  { %1055 = shalt.err (!%p1052_p1)
}
  0x23   :  { %53 = dma.hbm_to_vmem [thread:$0]  %s1307_s4, 3072, %s48_s28, [#allocation9], %s1109_s23, %s1109_s23, %s1110_s24  }
  0x24   :  { %1100 = dma.done.wait [#allocation6], 3072  }
  0x25   :  { %1101 = vsyncadd [#allocation6], 4294964224 }
  0x26   :  { %1102 = dma.done.wait [#allocation9], 3072  }
  0x27   :  { %1103 = vsyncadd [#allocation9], 4294964224  ;;  %v1112_v0 = vmov 0.0   ;;  %v1113_v1 = vmov 0   ;;  %vm1114_vm0 = vmmov 0   ;;  %p73_p2 = scmp.lt.s32.totalorder %s1303_s0, 63 }
  0x28   :  { %851 = vmatprep.subr.bf16.mxu1 %v1112_v0  ;;  %296 = vmatprep.mubr.bf16.mxu0 %v1113_v1  ;;  %v926_v2 = vld [vmem:[#allocation5 + $0x4] ss:$12 sps:$4 sm:$0xff]   ;;  %v928_v3 = vld [vmem:[#allocation5] ss:$12 sps:$4 sm:$0xff]   ;;  %v929_v4 = vld [vmem:[#allocation5 + $0x1c] ss:$12 sps:$4 sm:$0xff]  }
  0x29   :  { %867 = vmatprep.mubr.msk.bf16.mxu1 %vm1114_vm0, %v1112_v0  ;;  %264 = vmatprep.subr.bf16.mxu0 %v926_v2  ;;  %v931_v5 = vld [vmem:[#allocation5 + $0x18] ss:$12 sps:$4 sm:$0xff]   ;;  %v932_v6 = vld [vmem:[#allocation5 + $0x34] ss:$12 sps:$4 sm:$0xff]   ;;  %v934_v7 = vld [vmem:[#allocation5 + $0x30] ss:$12 sps:$4 sm:$0xff]  }
  0x2a   :  { %265 = vmatpush1.bf16.msra.mxu0 %v928_v3  ;;  %v935_v8 = vld [vmem:[#allocation5 + $0x4c] ss:$12 sps:$4 sm:$0xff]   ;;  %v946_v9 = vld [vmem:[#allocation5 + $0x8] ss:$12 sps:$4 sm:$0xff]   ;;  %v938_v11 = vld [vmem:[#allocation5 + $0x64] ss:$12 sps:$4 sm:$0xff]  }
  0x2b   :  { %266 = vmatprep.subr.bf16.mxu0 %v929_v4  ;;  %v937_v10 = vld [vmem:[#allocation5 + $0x48] ss:$12 sps:$4 sm:$0xff]   ;;  %852 = vmatpush3.bf16.msra.mxu1 %v946_v9  ;;  %v950_v12 = vld [vmem:[#allocation5 + $0x20] ss:$12 sps:$4 sm:$0xff]   ;;  %v952_v14 = vld [vmem:[#allocation5 + $0x38] ss:$12 sps:$4 sm:$0xff]   ;;  %v249_v4 = vlaneseq }
  0x2c   :  { %853 = vmatprep.subr.bf16.mxu1 %v1112_v0  ;;  %v940_v13 = vld [vmem:[#allocation5 + $0x60] ss:$12 sps:$4 sm:$0xff]   ;;  %v941_v15 = vld [vmem:[#allocation5 + $0x7c] ss:$12 sps:$4 sm:$0xff]   ;;  %v943_v16 = vld [vmem:[#allocation5 + $0x78] ss:$12 sps:$4 sm:$0xff]  }
  0x2d   :  { %s1315_s0 = smov (!%p73_p2, %s1303_s0), 63  ;;  %v956_v17 = vld [vmem:[#allocation5 + $0x50] ss:$12 sps:$4 sm:$0xff]   ;;  %v944_v18 = vld [vmem:[#allocation5 + $0x94] ss:$12 sps:$4 sm:$0xff]   ;;  %v991_v56 = vld [vmem:[%s1310_s7 + $0x8] sm:$0xff]  }
  0x2e   :  { %267 = vmatpush1.bf16.msra.mxu0 %v931_v5  ;;  %v947_v19 = vld [vmem:[#allocation5 + $0x90] ss:$12 sps:$4 sm:$0xff]   ;;  %s75_s23 = scalar_lea.vmem %s1304_s1, %s1315_s0  ;;  %v960_v20 = vld [vmem:[#allocation5 + $0x68] ss:$12 sps:$4 sm:$0xff]   ;;  %v948_v21 = vld [vmem:[#allocation5 + $0xac] ss:$12 sps:$4 sm:$0xff]  }
  0x2f   :  { %268 = vmatprep.subr.bf16.mxu0 %v932_v6  ;;  %854 = vmatpush3.bf16.msra.mxu1 %v950_v12  ;;  %v951_v22 = vld [vmem:[#allocation5 + $0xa8] ss:$12 sps:$4 sm:$0xff]   ;;  %v85_v23 = vld [vmem:[%s75_s23] sm:$0x1]  ;;  %v964_v24 = vld [vmem:[#allocation5 + $0x80] ss:$12 sps:$4 sm:$0xff]  }
  0x30   :  { %855 = vmatprep.subr.bf16.mxu1 %v1112_v0  ;;  %v955_v25 = vld [vmem:[#allocation8 + $0x4] ss:$12 sps:$4 sm:$0xff]   ;;  %v953_v26 = vld [vmem:[#allocation8] ss:$12 sps:$4 sm:$0xff]   ;;  %v86_v27 = vmax.bf16 %v1113_v1, %v85_v23  ;;  %v82_v29 = vld [vmem:[%s1305_s2] sm:$0x1] }
  0x31   :  { %v968_v28 = vld [vmem:[#allocation5 + $0x98] ss:$12 sps:$4 sm:$0xff]   ;;  %v959_v30 = vld [vmem:[#allocation8 + $0x1c] ss:$12 sps:$4 sm:$0xff]   ;;  %83 = vst [vmem:[#allocation2] sm:$0x1] %v82_v29 }
  0x32   :  { %269 = vmatpush1.bf16.msra.mxu0 %v934_v7  ;;  %v957_v31 = vld [vmem:[#allocation8 + $0x18] ss:$12 sps:$4 sm:$0xff]   ;;  %v972_v32 = vld [vmem:[#allocation5 + $0xb0] ss:$12 sps:$4 sm:$0xff]   ;;  %v963_v33 = vld [vmem:[#allocation8 + $0x34] ss:$12 sps:$4 sm:$0xff]  }
  0x33   :  { %270 = vmatprep.subr.bf16.mxu0 %v935_v8  ;;  %856 = vmatpush3.bf16.msra.mxu1 %v952_v14  ;;  %v961_v34 = vld [vmem:[#allocation8 + $0x30] ss:$12 sps:$4 sm:$0xff]   ;;  %v967_v35 = vld [vmem:[#allocation8 + $0x4c] ss:$12 sps:$4 sm:$0xff]   ;;  %v979_v36 = vld [vmem:[#allocation8 + $0x8] ss:$12 sps:$4 sm:$0xff]  }
  0x34   :  { %857 = vmatprep.subr.bf16.mxu1 %v1112_v0  ;;  %v965_v37 = vld [vmem:[#allocation8 + $0x48] ss:$12 sps:$4 sm:$0xff]   ;;  %v983_v38 = vld [vmem:[#allocation8 + $0x20] ss:$12 sps:$4 sm:$0xff]   ;;  %v971_v39 = vld [vmem:[#allocation8 + $0x64] ss:$12 sps:$4 sm:$0xff]  }
  0x35   :  { %v969_v40 = vld [vmem:[#allocation8 + $0x60] ss:$12 sps:$4 sm:$0xff]   ;;  %v984_v41 = vld [vmem:[#allocation8 + $0x38] ss:$12 sps:$4 sm:$0xff]   ;;  %v975_v42 = vld [vmem:[#allocation8 + $0x7c] ss:$12 sps:$4 sm:$0xff]  }
  0x36   :  { %271 = vmatpush1.bf16.msra.mxu0 %v937_v10  ;;  %v973_v43 = vld [vmem:[#allocation8 + $0x78] ss:$12 sps:$4 sm:$0xff]   ;;  %v985_v44 = vld [vmem:[#allocation8 + $0x50] ss:$12 sps:$4 sm:$0xff]   ;;  %v978_v45 = vld [vmem:[#allocation8 + $0x94] ss:$12 sps:$4 sm:$0xff]  }
  0x37   :  { %272 = vmatprep.subr.bf16.mxu0 %v938_v11  ;;  %858 = vmatpush3.bf16.msra.mxu1 %v956_v17  ;;  %v976_v46 = vld [vmem:[#allocation8 + $0x90] ss:$12 sps:$4 sm:$0xff]   ;;  %v986_v47 = vld [vmem:[#allocation8 + $0x68] ss:$12 sps:$4 sm:$0xff]   ;;  %v982_v48 = vld [vmem:[#allocation8 + $0xac] ss:$12 sps:$4 sm:$0xff]  }
  0x38   :  { %859 = vmatprep.subr.bf16.mxu1 %v1112_v0  ;;  %v980_v49 = vld [vmem:[#allocation8 + $0xa8] ss:$12 sps:$4 sm:$0xff]   ;;  %v1228_v50 = vld [vmem:[#allocation2] sm:$0x1]  ;;  %v987_v51 = vld [vmem:[#allocation8 + $0x80] ss:$12 sps:$4 sm:$0xff]  }
  0x39   :  { %v345_v52 = vpack.c.bf16 %v1228_v50, %v1228_v50  ;;  %v988_v53 = vld [vmem:[#allocation8 + $0x98] ss:$12 sps:$4 sm:$0xff]   ;;  %v989_v54 = vld [vmem:[#allocation8 + $0xb0] ss:$12 sps:$4 sm:$0xff]   ;;  %v250_v5 = vshrl.u32 %v249_v4, 7  ;;  %vm718_vm1 = vcmask 1040384  }
  0x3a   :  { %273 = vmatpush1.bf16.msra.mxu0 %v940_v13  ;;  %v990_v55 = vld [vmem:[%s1310_s7] sm:$0xff]   ;;  %v992_v57 = vld [vmem:[%s1310_s7 + $0x10] sm:$0xff]   ;;  %v993_v58 = vld [vmem:[%s1310_s7 + $0x18] sm:$0xff]   ;;  %s1115_s20 = smov [#allocation11]  }
  0x3b   :  { %274 = vmatprep.subr.bf16.mxu0 %v941_v15  ;;  %860 = vmatpush3.bf16.msra.mxu1 %v960_v20  ;;  %v994_v59 = vld [vmem:[%s1310_s7 + $0x20] sm:$0xff]   ;;  %v995_v60 = vld [vmem:[%s1310_s7 + $0x28] sm:$0xff]   ;;  %v996_v61 = vld [vmem:[%s1310_s7 + $0x30] sm:$0xff]   ;;  %v251_v6 = vsub.s32 0, %v250_v5  ;;  %v255_v8 = vsub.s32 1, %v250_v5  ;;  %s749_s21 = sshll.u32 %s1115_s20, 4  ;;  %s750_s21 = int_to_ptr.vmem [resolvable:$true] %s749_s21 }
  0x3c   :  { %861 = vmatprep.subr.bf16.mxu1 %v1112_v0  ;;  %v997_v62 = vld [vmem:[%s1310_s7 + $0x38] sm:$0xff]   ;;  %v119_v7 = vld [vmem:[%s1308_s5] sm:$0x7]  ;;  %s1056_s22 = scalar_lea.vmem %s750_s21, 16  ;;  %p1061_p4 = scmp.lt.s32.totalorder %s750_s21, %s750_s21 }
  0x3d   :  { %v252_v9 = vrot.slane %v119_v7, %v251_v6  ;;  %v256_v11 = vrot.slane %v119_v7, %v255_v8  ;;  %p1057_p3 = scmp.ne.s32.totalorder %s750_s21, %s1056_s22 }
  0x3e   :  { %275 = vmatpush1.bf16.msra.mxu0 %v943_v16 }
  0x3f   :  { %276 = vmatprep.subr.bf16.mxu0 %v944_v18  ;;  %862 = vmatpush3.bf16.msra.mxu1 %v964_v24  ;;  %v259_v24 = vsub.s32 2, %v250_v5 }
  0x40   :  { %863 = vmatprep.subr.bf16.mxu1 %v1112_v0 }
  0x42   :  { %277 = vmatpush1.bf16.msra.mxu0 %v947_v19 }
  0x43   :  { %278 = vmatprep.subr.bf16.mxu0 %v948_v21  ;;  %864 = vmatpush3.bf16.msra.mxu1 %v968_v28 }
  0x44   :  { %865 = vmatprep.subr.bf16.mxu1 %v1112_v0 }
  0x46   :  { %279 = vmatpush1.bf16.msra.mxu0 %v951_v22 }
  0x47   :  { %506 = vmatprep.subr.bf16.mxu0 %v955_v25  ;;  %866 = vmatpush3.bf16.msra.mxu1 %v972_v32 }
  0x48   :  { %871 = vmatprep.subr.bf16.mxu1 %v1112_v0 }
  0x49   :  { %297 = vmatmul.mubr.bf16.vlgmr.msra.gmra.mrb[0].mxu0 %v86_v27 }
  0x4a   :  { %507 = vmatpush1.bf16.msra.mxu0 %v953_v26  ;;  %538 = vmatprep.mubr.bf16.mxu0 %v1113_v1  ;;  %v601_v26 = vld [vmem:[%s1309_s6] sm:$0x1] }
  0x4b   :  { %508 = vmatprep.subr.bf16.mxu0 %v959_v30  ;;  %868 = vmatmul.mubr.bf16.vlgmr.msra.gmra.mrb[0].mxu1 %v86_v27  ;;  %v260_v27 = vrot.slane %v119_v7, %v259_v24 }
  0x4c   :  { %872 = vmatpush3.bf16.msra.mxu1 %v979_v36  ;;  %887 = vmatprep.mubr.msk.bf16.mxu1 %vm1114_vm0, %v1112_v0 }
  0x4d   :  { %873 = vmatprep.subr.bf16.mxu1 %v1112_v0 }
  0x4e   :  { %509 = vmatpush1.bf16.msra.mxu0 %v957_v31 }
  0x4f   :  { %510 = vmatprep.subr.bf16.mxu0 %v963_v33 }
  0x50   :  { %874 = vmatpush3.bf16.msra.mxu1 %v983_v38 }
  0x51   :  { %875 = vmatprep.subr.bf16.mxu1 %v1112_v0 }
  0x52   :  { %511 = vmatpush1.bf16.msra.mxu0 %v961_v34 }
  0x53   :  { %512 = vmatprep.subr.bf16.mxu0 %v967_v35 }
  0x54   :  { %876 = vmatpush3.bf16.msra.mxu1 %v984_v41  ;;  %v629_v41 = vld [vmem:[%s1311_s8] sm:$0x1]  ;;  %s1060_s8 = scalar_lea.vmem %s750_s21, 32 }
  0x55   :  { %877 = vmatprep.subr.bf16.mxu1 %v1112_v0  ;;  %p1062_p5 = scmp.lt.s32.totalorder %s1060_s8, %s1056_s22 }
  0x56   :  { %513 = vmatpush1.bf16.msra.mxu0 %v965_v37 }
  0x57   :  { %514 = vmatprep.subr.bf16.mxu0 %v971_v39  ;;  %p1063_p6 = por %p1062_p5, %p1061_p4 }
  0x58   :  { %878 = vmatpush3.bf16.msra.mxu1 %v985_v44 }
  0x59   :  { %879 = vmatprep.subr.bf16.mxu1 %v1112_v0  ;;  %p1064_p7 = pnand %p1063_p6, %p1057_p3 }
  0x5a   :  { %515 = vmatpush1.bf16.msra.mxu0 %v969_v40 }
  0x5b   :  { %516 = vmatprep.subr.bf16.mxu0 %v975_v42 }
  0x5c   :  { %880 = vmatpush3.bf16.msra.mxu1 %v986_v47 }
  0x5d   :  { %881 = vmatprep.subr.bf16.mxu1 %v1112_v0 }
  0x5e   :  { %517 = vmatpush1.bf16.msra.mxu0 %v973_v43 }
  0x5f   :  { %518 = vmatprep.subr.bf16.mxu0 %v978_v45 }
  0x60   :  { %882 = vmatpush3.bf16.msra.mxu1 %v987_v51 }
  0x61   :  { %883 = vmatprep.subr.bf16.mxu1 %v1112_v0 }
  0x62   :  { %519 = vmatpush1.bf16.msra.mxu0 %v976_v46 }
  0x63   :  { %520 = vmatprep.subr.bf16.mxu0 %v982_v48 }
  0x64   :  { %884 = vmatpush3.bf16.msra.mxu1 %v988_v53 }
  0x65   :  { %885 = vmatprep.subr.bf16.mxu1 %v1112_v0 }
  0x66   :  { %521 = vmatpush1.bf16.msra.mxu0 %v980_v49 }
  0x67   :  { %891 = vmatprep.subr.bf16.mxu0 %v1112_v0 }
  0x68   :  { %886 = vmatpush3.bf16.msra.mxu1 %v989_v54 }
  0x69   :  { %539 = vmatmul.mubr.bf16.vlgmr.msra.gmra.mrb[0].mxu0 %v345_v52 }
  0x6a   :  { %907 = vmatprep.mubr.msk.bf16.mxu0 %vm1114_vm0, %v1112_v0  ;;  %892 = vmatpush3.bf16.msra.mxu0 %v990_v55 }
  0x6b   :  { %888 = vmatmul.mubr.bf16.vlgmr.msra.gmra.mrb[4].mxu1 %v345_v52  ;;  %893 = vmatprep.subr.bf16.mxu0 %v1112_v0 }
  0x6e   :  { %894 = vmatpush3.bf16.msra.mxu0 %v991_v56 }
  0x6f   :  { %895 = vmatprep.subr.bf16.mxu0 %v1112_v0 }
  0x72   :  { %896 = vmatpush3.bf16.msra.mxu0 %v992_v57 }
  0x73   :  { %897 = vmatprep.subr.bf16.mxu0 %v1112_v0 }
  0x76   :  { %898 = vmatpush3.bf16.msra.mxu0 %v993_v58 }
  0x77   :  { %899 = vmatprep.subr.bf16.mxu0 %v1112_v0 }
  0x7a   :  { %900 = vmatpush3.bf16.msra.mxu0 %v994_v59 }
  0x7b   :  { %901 = vmatprep.subr.bf16.mxu0 %v1112_v0 }
  0x7e   :  { %902 = vmatpush3.bf16.msra.mxu0 %v995_v60 }
  0x7f   :  { %903 = vmatprep.subr.bf16.mxu0 %v1112_v0 }
  0x82   :  { %904 = vmatpush3.bf16.msra.mxu0 %v996_v61 }
  0x83   :  { %905 = vmatprep.subr.bf16.mxu0 %v1112_v0 }
  0x86   :  { %906 = vmatpush3.bf16.msra.mxu0 %v997_v62 }
 0x11e   :  { %v339_v63 = vpop.f32.mrb[0].mxu1 }
 0x11f   :  { %v869_v1 = vpop.f32.mrb[1].mxu1  ;;  %v340_v31 = vadd.f32 %v339_v63, %v260_v27 }
 0x120   :  { %v342_v2 = vpop.f32.mrb[2].mxu1 }
 0x121   :  { %v870_v3 = vpop.f32.mrb[3].mxu1 }
 0x13c   :  { %v540_v10 = vpop.f32.mrb[0].mxu0 }
 0x13d   :  { %v911_v12 = vadd.f32 %v540_v10, %v252_v9  ;;  %v542_v13 = vpop.f32.mrb[1].mxu0 }
 0x13e   :  { %v544_v14 = vpop.f32.mrb[2].mxu0  ;;  %v912_v16 = vadd.f32 %v542_v13, %v256_v11  ;;  %v581_v18 = vpop.f32.mrb[4].mxu1 }
 0x13f   :  { %v814_v0 = vmul.f32 -1.442695, %v911_v12  ;;  %v545_v15 = vpop.f32.mrb[3].mxu0  ;;  %v889_v19 = vpop.f32.mrb[5].mxu1  ;;  %v602_v29 = vadd.f32 %v601_v26, %v581_v18 }
 0x140   :  { %v815_v17 = vmul.f32 -1.442695, %v912_v16  ;;  %v584_v20 = vpop.f32.mrb[6].mxu1 }
 0x141   :  { %998 = vpow2.f32 %v814_v0  ;;  %v890_v21 = vpop.f32.mrb[7].mxu1 }
 0x142   :  { %1000 = vpow2.f32 %v815_v17 }
 0x14b   :  { %v999_v22 = vpop.eup %998 }
 0x14c   :  { %v591_v23 = vadd.f32 1.0, %v999_v22  ;;  %v1001_v25 = vpop.eup %1000 }
 0x14d   :  { %v598_v28 = vadd.f32 1.0, %v1001_v25 }
 0x14e   :  { %1002 = vrcp.f32 %v591_v23 }
 0x14f   :  { %1004 = vrcp.f32 %v598_v28 }
 0x158   :  { %v1003_v30 = vpop.eup %1002 }
 0x159   :  { %v603_v32 = vmul.f32 %v1003_v30, %v602_v29  ;;  %v1005_v34 = vpop.eup %1004 }
 0x15a   :  { %v606_v35 = vsub.f32 1.0, %v1005_v34  ;;  %v608_v38 = vmul.f32 %v1005_v34, %v1228_v50 }
 0x15b   :  { %v604_v33 = vadd.f32 %v603_v32, %v340_v31 }
 0x15d   :  { %1006 = vtanh.f32 %v604_v33 }
 0x167   :  { %v1007_v36 = vpop.eup %1006 }
 0x168   :  { %v607_v37 = vmul.f32 %v1007_v36, %v606_v35 }
 0x16a   :  { %v609_v39 = vadd.f32 %v608_v38, %v607_v37 }
 0x16c   :  { %610 = vst [vmem:[#allocation2] sm:$0x1] %v609_v39  ;;  %v612_v40 = vpack.c.bf16 %v609_v39, %v609_v39  ;;  %611 = vst [vmem:[#allocation11] sm:$0x1] %v609_v39 }
 0x16e   :  { %908 = vmatmul.mubr.bf16.vlgmr.msra.gmra.mrb[4].mxu0 %v612_v40 }
 0x241   :  { %v712_v42 = vpop.f32.mrb[4].mxu0 }
 0x242   :  { %v713_v43 = vadd.f32 %v712_v42, %v629_v41  ;;  %v909_v44 = vpop.f32.mrb[5].mxu0 }
 0x243   :  { %v715_v45 = vpop.f32.mrb[6].mxu0 }
 0x244   :  { %v910_v46 = vpop.f32.mrb[7].mxu0  ;;  %v719_v47 = vsel %vm718_vm1, %v713_v43, -inf }
 0x245   :  { %720 = vmax.xlane.f32.xlu0 %v719_v47 }
 0x2d2   :  { %v721_v48 = vpop.xlane.xlu0 %720 }
 0x2d3   :  { %v722_v49 = vsub.f32 %v713_v43, %v721_v48 }
 0x2d5   :  { %v723_v50 = vmul.f32 1.442695, %v722_v49 }
 0x2d7   :  { %1008 = vpow2.f32 %v723_v50 }
 0x2e1   :  { %v1009_v51 = vpop.eup %1008 }
 0x2e2   :  { %v725_v52 = vsel %vm718_vm1, %v1009_v51, 0.0 }
 0x2e3   :  { %726 = vadd.xlane.f32.xlu0 %v725_v52 }
 0x2e4   :  { %1067 = shalt.err (!%p1064_p7)
}
 0x2e5   :  { %s1068_s1 = scalar_lea.hbm %s1313_s10, 16 }
 0x2e6   :  { %p1069_p8 = scmp.ne.s32.totalorder %s1313_s10, %s1068_s1  ;;  %p1072_p9 = scmp.lt.u32.totalorder %s1068_s1, %s1313_s10 }
 0x2e8   :  { %p1074_p10 = pnand %p1072_p9, %p1069_p8 }
 0x2ea   :  { %1077 = shalt.err (!%p1074_p10)
}
 0x2eb   :  { %752 = dma.vmem_to_hbm [thread:$0]  %s750_s21, 16, %s1313_s10, [#allocation12]  }
 0x2ec   :  { %s1116_s29 = smov [#allocation10]  }
 0x2ed   :  { %s739_s30 = sshll.u32 %s1116_s29, 4  ;;  %s740_s30 = int_to_ptr.vmem [resolvable:$true] %s739_s30 }
 0x2ee   :  { %s1078_s11 = scalar_lea.vmem %s740_s30, 16  ;;  %s1082_s12 = scalar_lea.vmem %s740_s30, 32 }
 0x2ef   :  { %p1079_p11 = scmp.ne.s32.totalorder %s740_s30, %s1078_s11  ;;  %p1083_p12 = scmp.lt.s32.totalorder %s740_s30, %s740_s30 }
 0x2f0   :  { %p1084_p13 = scmp.lt.s32.totalorder %s1082_s12, %s1078_s11 }
 0x2f2   :  { %p1085_p0 = por %p1084_p13, %p1083_p12 }
 0x2f4   :  { %p1086_p1 = pnand %p1085_p0, %p1079_p11 }
 0x370   :  { %v727_v53 = vpop.xlane.xlu0 %726 }
 0x371   :  { %1010 = vlog2.f32 %v727_v53 }
 0x37b   :  { %v1011_v54 = vpop.eup %1010 }
 0x37c   :  { %v729_v55 = vmul.f32 0.6931472, %v1011_v54 }
 0x37e   :  { %v730_v56 = vadd.f32 %v729_v55, %v721_v48 }
 0x380   :  { %v731_v57 = vsub.f32 %v713_v43, %v730_v56 }
 0x382   :  { %732 = vst [vmem:[#allocation10] sm:$0x1] %v731_v57 }
 0x383   :  { %1089 = shalt.err (!%p1086_p1)
}
 0x384   :  { %s1090_s15 = scalar_lea.hbm %s1312_s9, 16 }
 0x385   :  { %p1091_p2 = scmp.ne.s32.totalorder %s1312_s9, %s1090_s15  ;;  %p1094_p3 = scmp.lt.u32.totalorder %s1090_s15, %s1312_s9 }
 0x387   :  { %p1096_p4 = pnand %p1094_p3, %p1091_p2 }
 0x389   :  { %1099 = shalt.err (!%p1096_p4)
}
 0x38a   :  { %742 = dma.vmem_to_hbm [thread:$0]  %s740_s30, 16, %s1312_s9, [#allocation7]  }
 0x38b   :  { %1104 = dma.done.wait [#allocation7], 16  }
 0x38c   :  { %1105 = vsyncadd [#allocation7], 4294967280 }
 0x38d   :  { %1106 = dma.done.wait [#allocation12], 16  }
 0x38e   :  { %1107 = vsyncadd [#allocation12], 4294967280 }
 0x38f   :  { %759 = vsyncpa [#allocation6], 1 }
 0x390   :  { %760 = vsyncpa [#allocation9], 1 }
 0x391   :  { %761 = vsyncpa [#allocation7], 1 }
 0x392   :  { %762 = vsyncpa [#allocation12], 1 }

</bundles_post_ra>
